<compile_context>
chip_gen: v7x
topology: tpu7x:2x2x1
jax: 0.10.0
libtpu: 0.0.40
codegen_flags: <defaults>
</compile_context>

<pallas_src>
import jax
import jax.numpy as jnp
from jax.experimental import pallas as pl
from jax.experimental.pallas import tpu as pltpu


def mlp_kernel(x_ref, w1_ref, b1_ref, w2t_ref, b2_ref, o_ref):
    # Layer 1 on the MXU: (tb, D) @ (D, H) -> (tb, H), f32 accumulation.
    h = jnp.dot(x_ref[...], w1_ref[...], preferred_element_type=jnp.float32)
    # Bias + ReLU in f32 on the VPU (v5e has no bf16 VPU -> keep f32).
    h = jnp.maximum(h + b1_ref[...].astype(jnp.float32), 0.0)
    # Layer 2 also on the MXU: (tb, H) @ (H, C) -> (tb, C).  w2 was transposed
    # in the wrapper so no in-kernel relayout is needed.
    out = jnp.dot(h, w2t_ref[...].astype(jnp.float32),
                  preferred_element_type=jnp.float32)
    out = out + b2_ref[...].astype(jnp.float32)          # (1, C) broadcast
    o_ref[...] = out.astype(o_ref.dtype)                 # direct (tb, C) store


def top_model_forward(x, w1, b1, w2, b2, *, batch_tile=None):
    """y = relu(x @ w1 + b1) @ w2.T + b2; w2/b2 in PyTorch (out, in)/(out,) layout.

    x is consumed in its own dtype (f32 or bf16) — no wrapper-side cast.
    """
    B, D = x.shape
    H = w1.shape[1]
    C = w2.shape[0]
    out_dtype = x.dtype

    # Tiny resident weights: match w1 to x's dtype for a clean MXU op; keep
    # the rest f32 (kernel casts internally, accumulation is f32 regardless).
    w1 = w1.astype(x.dtype)
    w2t = jnp.transpose(w2).astype(jnp.float32)           # (H, C)
    b1 = b1.reshape(1, H).astype(jnp.float32)
    b2_2d = b2.reshape(1, C).astype(jnp.float32)

    if batch_tile is None:
        if B <= 8:
            batch_tile = B                                 # single tiny block
        else:
            # Amortize per-step overhead; keep >= 2 grid steps when possible
            # (v7x megacore, double-buffering); stay well under scoped VMEM
            # defaults on all generations (double-buffered x <= ~7 MB).
            max_tile = 4096 if jnp.dtype(x.dtype).itemsize >= 4 else 8192
            batch_tile = min(max_tile,
                             max(8, pl.next_power_of_2(pl.cdiv(B, 2))))
    assert batch_tile == B or batch_tile % 8 == 0, \
        "batch_tile must equal B or be a multiple of 8"

    grid = (pl.cdiv(B, batch_tile),)                       # ragged last tile OK
    cost = pl.CostEstimate(
        flops=2 * B * D * H + 2 * B * H * C,
        transcendentals=0,
        bytes_accessed=(x.size * x.dtype.itemsize
                        + w1.size * w1.dtype.itemsize
                        + b1.size * b1.dtype.itemsize
                        + w2t.size * w2t.dtype.itemsize
                        + b2_2d.size * b2_2d.dtype.itemsize
                        + B * C * jnp.dtype(out_dtype).itemsize),
    )

    return pl.pallas_call(
        mlp_kernel,
        out_shape=jax.ShapeDtypeStruct((B, C), out_dtype),
        grid_spec=pltpu.PrefetchScalarGridSpec(
            num_scalar_prefetch=0,
            grid=grid,
            in_specs=[
                # x: tiled over batch; double-buffered by the pipeline.
                pl.BlockSpec((batch_tile, D), lambda i: (i, 0)),
                # Weights / biases: constant index maps -> resident in VMEM.
                pl.BlockSpec((D, H), lambda i: (0, 0)),
                pl.BlockSpec((1, H), lambda i: (0, 0)),
                pl.BlockSpec((H, C), lambda i: (0, 0)),
                pl.BlockSpec((1, C), lambda i: (0, 0)),
            ],
            out_specs=pl.BlockSpec((batch_tile, C), lambda i: (i, 0)),
        ),
        compiler_params=pltpu.CompilerParams(
            dimension_semantics=("parallel",)),
        cost_estimate=cost,
    )(x, w1, b1, w2t, b2_2d)


def init_params(key, input_dim=200, hidden=32, num_classes=1, dtype=jnp.float32):
    """Deterministic synthetic parameters (PyTorch-style uniform init ranges)."""
    k1, k2, k3, k4 = jax.random.split(key, 4)
    bound1 = 1.0 / (input_dim ** 0.5)
    bound2 = 1.0 / (hidden ** 0.5)
    w1 = jax.random.uniform(k1, (input_dim, hidden), dtype, -bound1, bound1)    # layer1 W^T
    b1 = jax.random.uniform(k2, (1, hidden), dtype, -bound1, bound1)
    w2 = jax.random.uniform(k3, (num_classes, hidden), dtype, -bound2, bound2)  # PyTorch (out, in)
    b2 = jax.random.uniform(k4, (num_classes,), dtype, -bound2, bound2)
    return w1, b1, w2, b2


if __name__ == "__main__":
    key = jax.random.PRNGKey(0)
    kx1, kx2, kx3, kp = jax.random.split(key, 4)

    D, H, C = 200, 32, 1
    w1, b1, w2, b2 = init_params(kp, D, H, C)

    def ref_fwd(xx):
        return jnp.maximum(xx.astype(jnp.float32) @ w1 + b1, 0.0) @ w2.T + b2[None, :]

    # 1) Small exact-f32 case (single block).
    x1 = jax.random.normal(kx1, (8, D), jnp.float32)
    out1 = jax.block_until_ready(top_model_forward(x1, w1, b1, w2, b2))
    assert out1.shape == (8, C)
    assert jnp.allclose(out1, ref_fwd(x1), atol=1e-5, rtol=1e-5)

    # 2) Ragged batch: 2-step grid with a masked partial last tile.
    x2 = jax.random.normal(kx2, (300, D), jnp.float32)
    out2 = jax.block_until_ready(top_model_forward(x2, w1, b1, w2, b2))
    assert out2.shape == (300, C)
    assert jnp.allclose(out2, ref_fwd(x2), atol=1e-5, rtol=1e-5)

    # 3) bf16 activations supplied by the producer (no wrapper cast of x).
    x3 = jax.random.normal(kx3, (256, D), jnp.float32).astype(jnp.bfloat16)
    out3 = jax.block_until_ready(top_model_forward(x3, w1, b1, w2, b2))
    assert out3.shape == (256, C)
    assert jnp.allclose(out3.astype(jnp.float32), ref_fwd(x3), atol=3e-2, rtol=3e-2)

    print("KERNEL_OK")
</pallas_src>

<mosaic_0001>
module attributes {stable_mosaic.version = 11 : i64} {
  func.func @mlp_kernel(%arg0: i32, %arg1: memref<8x200xf32, #tpu.memory_space<vmem>>, %arg2: memref<200x32xf32, #tpu.memory_space<vmem>>, %arg3: memref<1x32xf32, #tpu.memory_space<vmem>>, %arg4: memref<32x1xf32, #tpu.memory_space<vmem>>, %arg5: memref<1x1xf32, #tpu.memory_space<vmem>>, %arg6: memref<8x1xf32, #tpu.memory_space<vmem>>) attributes {dimension_semantics = [#tpu.dimension_semantics<parallel>], iteration_bounds = array<i64: 1>, scalar_prefetch = 0 : i64, scratch_operands = 0 : i64, tpu.core_type = #tpu.core_type<tc>, window_params = [{transform_indices = @transform_0, window_bounds = array<i64: 8, 200>}, {pipeline_mode = #tpu.pipeline_mode<synchronous>, transform_indices = @transform_1, window_bounds = array<i64: 200, 32>}, {pipeline_mode = #tpu.pipeline_mode<synchronous>, transform_indices = @transform_2, window_bounds = array<i64: 1, 32>}, {pipeline_mode = #tpu.pipeline_mode<synchronous>, transform_indices = @transform_3, window_bounds = array<i64: 32, 1>}, {pipeline_mode = #tpu.pipeline_mode<synchronous>, transform_indices = @transform_4, window_bounds = array<i64: 1, 1>}, {transform_indices = @transform_5, window_bounds = array<i64: 8, 1>}]} {
    %c0 = arith.constant 0 : index
    %c0_0 = arith.constant 0 : index
    %0 = vector.load %arg1[%c0, %c0_0] : memref<8x200xf32, #tpu.memory_space<vmem>>, vector<8x200xf32>
    %c0_1 = arith.constant 0 : index
    %c0_2 = arith.constant 0 : index
    %1 = vector.load %arg2[%c0_1, %c0_2] : memref<200x32xf32, #tpu.memory_space<vmem>>, vector<200x32xf32>
    %cst = arith.constant dense<0.000000e+00> : vector<8x32xf32>
    %2 = tpu.matmul %0, %1, %cst {dimension_numbers = #tpu.dot_dimension_numbers<[1], [0], [0], [1], [0, 0, 1, 1], [], []>} : vector<8x200xf32>, vector<200x32xf32>, vector<8x32xf32> -> vector<8x32xf32>
    %c0_3 = arith.constant 0 : index
    %c0_4 = arith.constant 0 : index
    %3 = vector.load %arg3[%c0_3, %c0_4] : memref<1x32xf32, #tpu.memory_space<vmem>>, vector<1x32xf32>
    %4 = vector.broadcast %3 : vector<1x32xf32> to vector<8x32xf32>
    %5 = arith.addf %2, %4 : vector<8x32xf32>
    %cst_5 = arith.constant 0.000000e+00 : f32
    %6 = vector.broadcast %cst_5 : f32 to vector<8x32xf32>
    %7 = arith.maximumf %5, %6 : vector<8x32xf32>
    %c0_6 = arith.constant 0 : index
    %c0_7 = arith.constant 0 : index
    %8 = vector.load %arg4[%c0_6, %c0_7] : memref<32x1xf32, #tpu.memory_space<vmem>>, vector<32x1xf32>
    %cst_8 = arith.constant dense<0.000000e+00> : vector<8x1xf32>
    %9 = tpu.matmul %7, %8, %cst_8 {dimension_numbers = #tpu.dot_dimension_numbers<[1], [0], [0], [1], [0, 0, 1, 1], [], []>} : vector<8x32xf32>, vector<32x1xf32>, vector<8x1xf32> -> vector<8x1xf32>
    %c0_9 = arith.constant 0 : index
    %c0_10 = arith.constant 0 : index
    %10 = vector.load %arg5[%c0_9, %c0_10] : memref<1x1xf32, #tpu.memory_space<vmem>>, vector<1x1xf32>
    %11 = vector.broadcast %10 : vector<1x1xf32> to vector<8x1xf32>
    %12 = arith.addf %9, %11 : vector<8x1xf32>
    %c0_11 = arith.constant 0 : index
    %c0_12 = arith.constant 0 : index
    %13 = vector.load %arg6[%c0_11, %c0_12] : memref<8x1xf32, #tpu.memory_space<vmem>>, vector<8x1xf32>
    tpu.vector_store %arg6[%c0_11, %c0_12], %12 {strides = array<i32>} : memref<8x1xf32, #tpu.memory_space<vmem>>, vector<8x1xf32>,
    return
  }
  func.func @transform_0(%arg0: i32) -> (i32, i32) {
    %c0_i32 = arith.constant 0 : i32
    %c0_i32_0 = arith.constant 0 : i32
    return %arg0, %c0_i32 : i32, i32
  }
  func.func @transform_1(%arg0: i32) -> (i32, i32) {
    %c0_i32 = arith.constant 0 : i32
    %c0_i32_0 = arith.constant 0 : i32
    %c0_i32_1 = arith.constant 0 : i32
    return %c0_i32, %c0_i32_0 : i32, i32
  }
  func.func @transform_2(%arg0: i32) -> (i32, i32) {
    %c0_i32 = arith.constant 0 : i32
    %c0_i32_0 = arith.constant 0 : i32
    %c0_i32_1 = arith.constant 0 : i32
    return %c0_i32, %c0_i32_0 : i32, i32
  }
  func.func @transform_3(%arg0: i32) -> (i32, i32) {
    %c0_i32 = arith.constant 0 : i32
    %c0_i32_0 = arith.constant 0 : i32
    %c0_i32_1 = arith.constant 0 : i32
    return %c0_i32, %c0_i32_0 : i32, i32
  }
  func.func @transform_4(%arg0: i32) -> (i32, i32) {
    %c0_i32 = arith.constant 0 : i32
    %c0_i32_0 = arith.constant 0 : i32
    %c0_i32_1 = arith.constant 0 : i32
    return %c0_i32, %c0_i32_0 : i32, i32
  }
  func.func @transform_5(%arg0: i32) -> (i32, i32) {
    %c0_i32 = arith.constant 0 : i32
    %c0_i32_0 = arith.constant 0 : i32
    return %arg0, %c0_i32 : i32, i32
  }
}

</mosaic_0001>

<bundles_post_ra>
// kernel: tpu_custom_call.1
= control target key start
LH: loop header
LB: loop body
LE: loop exit
PB: predicated region body
PF: predicated region fallthrough
CT: control target
= control target key end

     0   :  { %v287_v0 = vmov 0.0|0.0   ;;  %vm56_vm0 = vcmask 588800   ;;  %v288_v41 = vmov 0.0   ;;  %vm289_vm1 = vmmov 0   ;;  %s436_s1 = inlined_call_operand.vmem [shape: f32[200,32], index: 1, kind: input, shape index: {}]   ;;  %s437_s0 = inlined_call_operand.vmem [shape: f32[8,200], index: 0, kind: input, shape index: {}]   ;;  %s438_s3 = inlined_call_operand.vmem [shape: f32[32,1], index: 3, kind: input, shape index: {}]   ;;  %s439_s4 = inlined_call_operand.<no memory space> [shape: f32[1,1], index: 4, kind: input, shape index: {}]   ;;  %s440_s2 = inlined_call_operand.vmem [shape: f32[1,32], index: 2, kind: input, shape index: {}]   ;;  %s441_s5 = inlined_call_operand.vmem [shape: f32[8,1], index: 5, kind: output, shape index: {}]  }
   0x1   :  { %242 = vmatprep.subr.bf16.mxu0 %v287_v0  ;;  %v24_v1 = vld [vmem:[%s436_s1] sm:$0xff]  ;;  %v25_v2 = vld [vmem:[%s436_s1 + $0x8] sm:$0xff]  ;;  %v26_v3 = vld [vmem:[%s436_s1 + $0x10] sm:$0xff]  ;;  %278 = vmatprep.subr.bf16.mxu1 %v287_v0  ;;  %v10_v47 = vstv %s439_s4  ;;  %vm142_vm2 = vcmask 261120   ;;  %vm216_vm3 = vcmask 7168  }
   0x2   :  { %v243_v4 = vpack.c.bf16 %v25_v2, %v24_v1  ;;  %v27_v5 = vld [vmem:[%s436_s1 + $0x18] sm:$0xff]  ;;  %v28_v7 = vld [vmem:[%s436_s1 + $0x20] sm:$0xff]  ;;  %v29_v8 = vld [vmem:[%s436_s1 + $0x28] sm:$0xff]  ;;  %239 = vmatprep.mubr.msk.f32.mxu1 %vm289_vm1, %v288_v41  ;;  %11 = vst [vmem:[#allocation2] sm:$0x1] %v10_v47 }
   0x3   :  { %v246_v6 = vpack.c.bf16 %v27_v5, %v26_v3  ;;  %v249_v9 = vpack.c.bf16 %v29_v8, %v28_v7  ;;  %v30_v10 = vld [vmem:[%s436_s1 + $0x30] sm:$0xff]  ;;  %v31_v11 = vld [vmem:[%s436_s1 + $0x38] sm:$0xff]  ;;  %v23_v12 = vld [vmem:[%s437_s0 + $0x8] sm:$0xff] }
   0x4   :  { %244 = vmatpush1.bf16.msra.mxu0 %v243_v4  ;;  %223 = vmatprep.mubr.msk.f32.mxu0 %vm56_vm0, %v23_v12  ;;  %v131_v13 = vld [vmem:[%s438_s3] sm:$0xff]  ;;  %v132_v14 = vld [vmem:[%s438_s3 + $0x8] sm:$0xff]  ;;  %v252_v16 = vpack.c.bf16 %v31_v11, %v30_v10  ;;  %v34_v20 = vld [vmem:[%s436_s1 + $0x50] sm:$0xff] }
   0x5   :  { %245 = vmatprep.subr.bf16.mxu0 %v287_v0  ;;  %v279_v15 = vpack.c.bf16 %v132_v14, %v131_v13  ;;  %v32_v17 = vld [vmem:[%s436_s1 + $0x40] sm:$0xff]  ;;  %v33_v18 = vld [vmem:[%s436_s1 + $0x48] sm:$0xff]  ;;  %v35_v21 = vld [vmem:[%s436_s1 + $0x58] sm:$0xff] }
   0x6   :  { %v255_v19 = vpack.c.bf16 %v33_v18, %v32_v17  ;;  %v258_v22 = vpack.c.bf16 %v35_v21, %v34_v20  ;;  %v36_v23 = vld [vmem:[%s436_s1 + $0x60] sm:$0xff]  ;;  %v37_v24 = vld [vmem:[%s436_s1 + $0x68] sm:$0xff]  ;;  %v38_v26 = vld [vmem:[%s436_s1 + $0x70] sm:$0xff] }
   0x7   :  { %280 = vmatpush3.bf16.msra.mxu1 %v279_v15  ;;  %v261_v25 = vpack.c.bf16 %v37_v24, %v36_v23  ;;  %v39_v27 = vld [vmem:[%s436_s1 + $0x78] sm:$0xff]  ;;  %v40_v29 = vld [vmem:[%s436_s1 + $0x80] sm:$0xff]  ;;  %v41_v30 = vld [vmem:[%s436_s1 + $0x88] sm:$0xff] }
   0x8   :  { %247 = vmatpush1.bf16.msra.mxu0 %v246_v6  ;;  %281 = vmatprep.subr.bf16.mxu1 %v287_v0  ;;  %v264_v28 = vpack.c.bf16 %v39_v27, %v38_v26  ;;  %v267_v31 = vpack.c.bf16 %v41_v30, %v40_v29  ;;  %v42_v32 = vld [vmem:[%s436_s1 + $0x90] sm:$0xff]  ;;  %v43_v33 = vld [vmem:[%s436_s1 + $0x98] sm:$0xff]  ;;  %v44_v35 = vld [vmem:[%s436_s1 + $0xa0] sm:$0xff] }
   0x9   :  { %248 = vmatprep.subr.bf16.mxu0 %v287_v0  ;;  %v270_v34 = vpack.c.bf16 %v43_v33, %v42_v32  ;;  %v45_v36 = vld [vmem:[%s436_s1 + $0xa8] sm:$0xff]  ;;  %v46_v38 = vld [vmem:[%s436_s1 + $0xb0] sm:$0xff]  ;;  %v47_v39 = vld [vmem:[%s436_s1 + $0xb8] sm:$0xff] }
   0xa   :  { %v273_v37 = vpack.c.bf16 %v45_v36, %v44_v35  ;;  %v276_v40 = vpack.c.bf16 %v47_v39, %v46_v38  ;;  %v48_v42 = vld [vmem:[%s436_s1 + $0xc0] sm:$0xff]  ;;  %v133_v44 = vld [vmem:[%s438_s3 + $0x10] sm:$0xff]  ;;  %v134_v45 = vld [vmem:[%s438_s3 + $0x18] sm:$0xff] }
   0xb   :  { %v22_v43 = vld [vmem:[%s437_s0] sm:$0xff]  ;;  %v282_v46 = vpack.c.bf16 %v134_v45, %v133_v44 }
   0xc   :  { %250 = vmatpush1.bf16.msra.mxu0 %v249_v9  ;;  %v222_v48 = vld [vmem:[%s440_s2] ss:$0 sm:$0xff] }
   0xd   :  { %251 = vmatprep.subr.bf16.mxu0 %v287_v0  ;;  %283 = vmatpush3.bf16.msra.mxu1 %v282_v46  ;;  %v224_v53 = vld [vmem:[#allocation2] ss:$0 sm:$0xff] }
  0x10   :  { %253 = vmatpush1.bf16.msra.mxu0 %v252_v16 }
  0x11   :  { %254 = vmatprep.subr.bf16.mxu0 %v287_v0 }
  0x14   :  { %256 = vmatpush1.bf16.msra.mxu0 %v255_v19 }
  0x15   :  { %257 = vmatprep.subr.bf16.mxu0 %v287_v0 }
  0x18   :  { %259 = vmatpush1.bf16.msra.mxu0 %v258_v22 }
  0x19   :  { %260 = vmatprep.subr.bf16.mxu0 %v287_v0 }
  0x1c   :  { %262 = vmatpush1.bf16.msra.mxu0 %v261_v25 }
  0x1d   :  { %263 = vmatprep.subr.bf16.mxu0 %v287_v0 }
  0x20   :  { %265 = vmatpush1.bf16.msra.mxu0 %v264_v28 }
  0x21   :  { %266 = vmatprep.subr.bf16.mxu0 %v287_v0 }
  0x24   :  { %268 = vmatpush1.bf16.msra.mxu0 %v267_v31 }
  0x25   :  { %269 = vmatprep.subr.bf16.mxu0 %v287_v0 }
  0x28   :  { %271 = vmatpush1.bf16.msra.mxu0 %v270_v34 }
  0x29   :  { %272 = vmatprep.subr.bf16.mxu0 %v287_v0 }
  0x2c   :  { %274 = vmatpush1.bf16.msra.mxu0 %v273_v37 }
  0x2d   :  { %275 = vmatprep.subr.bf16.mxu0 %v287_v0 }
  0x30   :  { %277 = vmatpush1.bf16.msra.mxu0 %v276_v40 }
  0x31   :  { %108 = vmatprep.subr.mxu0 %v288_v41 }
  0x34   :  { %109 = vmatpush1.msra.mxu0 %v48_v42 }
  0x35   :  { %125 = vmatmul.mubr.f32.vlgmr.msra.gmra.mrb[0].mxu0 %v22_v43 }
 0x108   :  { %v126_v49 = vpop.f32.mrb[0].mxu0 }
 0x109   :  { %v127_v50 = vadd.f32 %v222_v48, %v126_v49  ;;  %v128_v51 = vpop.f32.mrb[1].mxu0 }
 0x10b   :  { %v130_v52 = vmax.f32 %v127_v50, 0.0 }
 0x10d   :  { %240 = vmatmul.mubr.msk.f32.vlgmr.msra.gmra.mrb[0].mxu1 %vm142_vm2, %v130_v52 }
 0x1e0   :  { %v212_v54 = vpop.f32.mrb[0].mxu1 }
 0x1e1   :  { %v213_v55 = vadd.f32 %v224_v53, %v212_v54  ;;  %v241_v56 = vpop.f32.mrb[1].mxu1 }
 0x1e3   :  { %217 = vst.msk [vmem:[%s441_s5] sm:$0xff] %vm216_vm3, %v213_v55 }

</bundles_post_ra>
